<compile_context>
chip_gen: v6e
topology: v6e:2x2x1
jax: 0.10.0
libtpu: 0.0.40
codegen_flags: <defaults>
</compile_context>

<pallas_src>
import jax
import jax.numpy as jnp
from jax.experimental import pallas as pl
from jax.experimental.pallas import tpu as pltpu

EPS = 1e-5  # nn.LayerNorm default


def _round_up(x, m):
    return ((x + m - 1) // m) * m


def prenorm_linear_kernel(x_ref, gamma_ref, beta_ref, w_ref, bias_ref, o_ref):
    # x_ref: (tm, D) row tile.  gamma/beta/bias: (1, D) f32.  w: (D, D) bf16.
    x = x_ref[...].astype(jnp.float32)
    d = x.shape[-1]
    inv_d = 1.0 / d

    # One-pass LayerNorm statistics: var = E[x^2] - mean^2 (biased, as torch).
    s1 = jnp.sum(x, axis=-1, keepdims=True)
    s2 = jnp.sum(x * x, axis=-1, keepdims=True)
    mean = s1 * inv_d
    var = jnp.maximum(s2 * inv_d - mean * mean, 0.0)
    inv = jax.lax.rsqrt(var + EPS)

    y = (x - mean) * inv * gamma_ref[...] + beta_ref[...]

    # fn = Linear(D, D): bf16 MXU matmul with f32 accumulation.
    out = jnp.dot(y.astype(w_ref.dtype), w_ref[...],
                  preferred_element_type=jnp.float32)
    out = out + bias_ref[...]
    o_ref[...] = out.astype(o_ref.dtype)


def prenorm(x, gamma, beta, w, bias, *, tm=256, matmul_dtype=jnp.bfloat16):
    """x: (B, N, D).  Returns fn(LayerNorm(x)) with fn = Linear(D, D)."""
    B, N, D = x.shape
    rows = B * N
    x2 = x.reshape(rows, D)

    # Row tile: multiple of 8 (sublane), no larger than the (padded) row count.
    tm = max(8, min(_round_up(tm, 8), _round_up(rows, 8)))
    rows_p = _round_up(rows, tm)
    if rows_p != rows:
        x2 = jnp.pad(x2, ((0, rows_p - rows), (0, 0)))
    grid = rows_p // tm

    # Params: cast once here (not per grid step inside the kernel body).
    gamma2 = gamma.reshape(1, D).astype(jnp.float32)
    beta2 = beta.reshape(1, D).astype(jnp.float32)
    bias2 = bias.reshape(1, D).astype(jnp.float32)
    w2 = w.astype(matmul_dtype)          # bf16 weight: MXU-native, half VMEM.
    # TODO(synk): for very large D on v7x (64 MiB VMEM) also tile W's output
    # dim (or single-buffer the constant blocks) instead of one (D, D) block.

    def _isz(dt):
        return jnp.dtype(dt).itemsize

    x_tile = tm * D * _isz(x2.dtype)
    o_tile = tm * D * _isz(x.dtype)
    w_bytes = D * D * _isz(w2.dtype)
    param_bytes = 3 * D * 4
    # 2x double-buffered pipelined blocks + f32 intermediates headroom.
    vmem_bytes = 2 * (x_tile + o_tile + w_bytes + param_bytes) + 4 * tm * D * 4
    vmem_bytes = int(min(max(vmem_bytes, 8 << 20), 64 << 20))

    cost = pl.CostEstimate(
        flops=2 * rows_p * D * D,
        transcendentals=rows_p,  # one rsqrt per row
        bytes_accessed=(rows_p * D * (_isz(x2.dtype) + _isz(x.dtype))
                        + D * D * _isz(w2.dtype) + 3 * D * 4),
    )

    out2 = pl.pallas_call(
        prenorm_linear_kernel,
        out_shape=jax.ShapeDtypeStruct((rows_p, D), x.dtype),
        grid_spec=pltpu.PrefetchScalarGridSpec(
            num_scalar_prefetch=0,
            grid=(grid,),
            in_specs=[
                pl.BlockSpec((tm, D), lambda i: (i, 0)),   # x row tile
                pl.BlockSpec((1, D), lambda i: (0, 0)),    # gamma (f32)
                pl.BlockSpec((1, D), lambda i: (0, 0)),    # beta  (f32)
                pl.BlockSpec((D, D), lambda i: (0, 0)),    # W     (bf16)
                pl.BlockSpec((1, D), lambda i: (0, 0)),    # bias  (f32)
            ],
            out_specs=pl.BlockSpec((tm, D), lambda i: (i, 0)),
        ),
        compiler_params=pltpu.CompilerParams(
            dimension_semantics=("parallel",),
            vmem_limit_bytes=vmem_bytes),
        cost_estimate=cost,
    )(x2, gamma2, beta2, w2, bias2)

    return out2[:rows].reshape(B, N, D)


def prenorm_reference(x, gamma, beta, w, bias, matmul_dtype=jnp.bfloat16):
    xf = x.astype(jnp.float32)
    mean = jnp.mean(xf, axis=-1, keepdims=True)
    var = jnp.mean((xf - mean) ** 2, axis=-1, keepdims=True)
    y = (xf - mean) * jax.lax.rsqrt(var + EPS) * gamma.astype(jnp.float32) \
        + beta.astype(jnp.float32)
    out = jnp.dot(y.astype(matmul_dtype), w.astype(matmul_dtype),
                  preferred_element_type=jnp.float32)
    return (out + bias.astype(jnp.float32)).astype(x.dtype)


if __name__ == "__main__":
    # Small but lane-dense shapes: D = 128 (multiple of 128); rows = 120 with
    # tm = 64 exercises both a multi-step grid and the pad-to-tile path.
    B, N, D = 2, 60, 128
    key = jax.random.PRNGKey(0)
    kx, kw, kb = jax.random.split(key, 3)

    x = jax.random.normal(kx, (B, N, D), dtype=jnp.float32)

    # nn.LayerNorm(dim) init: gamma = 1, beta = 0.
    gamma = jnp.ones((D,), jnp.float32)
    beta = jnp.zeros((D,), jnp.float32)
    # fn = Linear(dim, dim) weights, deterministic random init.
    w = jax.random.normal(kw, (D, D), dtype=jnp.float32) * 0.05
    bias = jax.random.normal(kb, (D,), dtype=jnp.float32) * 0.01

    out = prenorm(x, gamma, beta, w, bias, tm=64)
    out = jax.block_until_ready(out)

    ref = prenorm_reference(x, gamma, beta, w, bias)
    assert out.shape == (B, N, D)
    assert jnp.allclose(out, ref, atol=5e-3, rtol=5e-3), "mismatch vs reference"

    print("KERNEL_OK")
</pallas_src>

<mosaic_0001>
module attributes {stable_mosaic.version = 11 : i64} {
  func.func @prenorm_linear_kernel(%arg0: i32, %arg1: memref<64x128xf32, #tpu.memory_space<vmem>>, %arg2: memref<1x128xf32, #tpu.memory_space<vmem>>, %arg3: memref<1x128xf32, #tpu.memory_space<vmem>>, %arg4: memref<128x128xbf16, #tpu.memory_space<vmem>>, %arg5: memref<1x128xf32, #tpu.memory_space<vmem>>, %arg6: memref<64x128xf32, #tpu.memory_space<vmem>>) attributes {dimension_semantics = [#tpu.dimension_semantics<parallel>], iteration_bounds = array<i64: 2>, scalar_prefetch = 0 : i64, scratch_operands = 0 : i64, tpu.core_type = #tpu.core_type<tc>, window_params = [{transform_indices = @transform_0, window_bounds = array<i64: 64, 128>}, {pipeline_mode = #tpu.pipeline_mode<synchronous>, transform_indices = @transform_1, window_bounds = array<i64: 1, 128>}, {pipeline_mode = #tpu.pipeline_mode<synchronous>, transform_indices = @transform_2, window_bounds = array<i64: 1, 128>}, {pipeline_mode = #tpu.pipeline_mode<synchronous>, transform_indices = @transform_3, window_bounds = array<i64: 128, 128>}, {pipeline_mode = #tpu.pipeline_mode<synchronous>, transform_indices = @transform_4, window_bounds = array<i64: 1, 128>}, {transform_indices = @transform_5, window_bounds = array<i64: 64, 128>}]} {
    %c0 = arith.constant 0 : index
    %c0_0 = arith.constant 0 : index
    %0 = vector.load %arg1[%c0, %c0_0] : memref<64x128xf32, #tpu.memory_space<vmem>>, vector<64x128xf32>
    %cst = arith.constant dense<0.000000e+00> : vector<64xf32>
    %1 = vector.multi_reduction <add>, %0, %cst [1] : vector<64x128xf32> to vector<64xf32>
    %2 = vector.shape_cast %1 : vector<64xf32> to vector<64x1xf32>
    %3 = arith.mulf %0, %0 : vector<64x128xf32>
    %cst_1 = arith.constant dense<0.000000e+00> : vector<64xf32>
    %4 = vector.multi_reduction <add>, %3, %cst_1 [1] : vector<64x128xf32> to vector<64xf32>
    %5 = vector.shape_cast %4 : vector<64xf32> to vector<64x1xf32>
    %cst_2 = arith.constant 7.812500e-03 : f32
    %6 = vector.broadcast %cst_2 : f32 to vector<64x1xf32>
    %7 = arith.mulf %2, %6 : vector<64x1xf32>
    %cst_3 = arith.constant 7.812500e-03 : f32
    %8 = vector.broadcast %cst_3 : f32 to vector<64x1xf32>
    %9 = arith.mulf %5, %8 : vector<64x1xf32>
    %10 = arith.mulf %7, %7 : vector<64x1xf32>
    %11 = arith.subf %9, %10 : vector<64x1xf32>
    %cst_4 = arith.constant 0.000000e+00 : f32
    %12 = vector.broadcast %cst_4 : f32 to vector<64x1xf32>
    %13 = arith.maximumf %11, %12 : vector<64x1xf32>
    %cst_5 = arith.constant 9.99999974E-6 : f32
    %14 = vector.broadcast %cst_5 : f32 to vector<64x1xf32>
    %15 = arith.addf %13, %14 : vector<64x1xf32>
    %16 = math.rsqrt %15 : vector<64x1xf32>
    %17 = vector.broadcast %7 : vector<64x1xf32> to vector<64x128xf32>
    %18 = arith.subf %0, %17 : vector<64x128xf32>
    %19 = vector.broadcast %16 : vector<64x1xf32> to vector<64x128xf32>
    %20 = arith.mulf %18, %19 : vector<64x128xf32>
    %c0_6 = arith.constant 0 : index
    %c0_7 = arith.constant 0 : index
    %21 = vector.load %arg2[%c0_6, %c0_7] : memref<1x128xf32, #tpu.memory_space<vmem>>, vector<1x128xf32>
    %22 = vector.broadcast %21 : vector<1x128xf32> to vector<64x128xf32>
    %23 = arith.mulf %20, %22 : vector<64x128xf32>
    %c0_8 = arith.constant 0 : index
    %c0_9 = arith.constant 0 : index
    %24 = vector.load %arg3[%c0_8, %c0_9] : memref<1x128xf32, #tpu.memory_space<vmem>>, vector<1x128xf32>
    %25 = vector.broadcast %24 : vector<1x128xf32> to vector<64x128xf32>
    %26 = arith.addf %23, %25 : vector<64x128xf32>
    %27 = arith.truncf %26 : vector<64x128xf32> to vector<64x128xbf16>
    %c0_10 = arith.constant 0 : index
    %c0_11 = arith.constant 0 : index
    %28 = vector.load %arg4[%c0_10, %c0_11] : memref<128x128xbf16, #tpu.memory_space<vmem>>, vector<128x128xbf16>
    %cst_12 = arith.constant dense<0.000000e+00> : vector<64x128xf32>
    %29 = tpu.matmul %27, %28, %cst_12 {dimension_numbers = #tpu.dot_dimension_numbers<[1], [0], [0], [1], [0, 0, 1, 1], [], []>} : vector<64x128xbf16>, vector<128x128xbf16>, vector<64x128xf32> -> vector<64x128xf32>
    %c0_13 = arith.constant 0 : index
    %c0_14 = arith.constant 0 : index
    %30 = vector.load %arg5[%c0_13, %c0_14] : memref<1x128xf32, #tpu.memory_space<vmem>>, vector<1x128xf32>
    %31 = vector.broadcast %30 : vector<1x128xf32> to vector<64x128xf32>
    %32 = arith.addf %29, %31 : vector<64x128xf32>
    %c0_15 = arith.constant 0 : index
    %c0_16 = arith.constant 0 : index
    %33 = vector.load %arg6[%c0_15, %c0_16] : memref<64x128xf32, #tpu.memory_space<vmem>>, vector<64x128xf32>
    tpu.vector_store %arg6[%c0_15, %c0_16], %32 {strides = array<i32>} : memref<64x128xf32, #tpu.memory_space<vmem>>, vector<64x128xf32>,
    return
  }
  func.func @transform_0(%arg0: i32) -> (i32, i32) {
    %c0_i32 = arith.constant 0 : i32
    %c0_i32_0 = arith.constant 0 : i32
    return %arg0, %c0_i32 : i32, i32
  }
  func.func @transform_1(%arg0: i32) -> (i32, i32) {
    %c0_i32 = arith.constant 0 : i32
    %c0_i32_0 = arith.constant 0 : i32
    %c0_i32_1 = arith.constant 0 : i32
    return %c0_i32, %c0_i32_0 : i32, i32
  }
  func.func @transform_2(%arg0: i32) -> (i32, i32) {
    %c0_i32 = arith.constant 0 : i32
    %c0_i32_0 = arith.constant 0 : i32
    %c0_i32_1 = arith.constant 0 : i32
    return %c0_i32, %c0_i32_0 : i32, i32
  }
  func.func @transform_3(%arg0: i32) -> (i32, i32) {
    %c0_i32 = arith.constant 0 : i32
    %c0_i32_0 = arith.constant 0 : i32
    %c0_i32_1 = arith.constant 0 : i32
    return %c0_i32, %c0_i32_0 : i32, i32
  }
  func.func @transform_4(%arg0: i32) -> (i32, i32) {
    %c0_i32 = arith.constant 0 : i32
    %c0_i32_0 = arith.constant 0 : i32
    %c0_i32_1 = arith.constant 0 : i32
    return %c0_i32, %c0_i32_0 : i32, i32
  }
  func.func @transform_5(%arg0: i32) -> (i32, i32) {
    %c0_i32 = arith.constant 0 : i32
    %c0_i32_0 = arith.constant 0 : i32
    return %arg0, %c0_i32 : i32, i32
  }
}

</mosaic_0001>

<bundles_post_ra>
// kernel: tpu_custom_call.1
= control target key start
LH: loop header
LB: loop body
LE: loop exit
PB: predicated region body
PF: predicated region fallthrough
CT: control target
= control target key end

     0   :  { %10 = vsyncpa [#allocation3], 0  ;;  %s1265_s0 = inlined_call_operand.hbm [shape: f32[128,128], index: 0, kind: input, shape index: {}]   ;;  %s1266_s1 = inlined_call_operand.vmem [shape: f32[1,128], index: 1, kind: input, shape index: {}]   ;;  %s1267_s2 = inlined_call_operand.vmem [shape: f32[1,128], index: 2, kind: input, shape index: {}]   ;;  %s1268_s3 = inlined_call_operand.hbm [shape: bf16[128,128], index: 3, kind: input, shape index: {}]   ;;  %s1269_s4 = inlined_call_operand.vmem [shape: f32[1,128], index: 4, kind: input, shape index: {}]   ;;  %s1270_s5 = inlined_call_operand.hbm [shape: f32[128,128], index: 5, kind: output, shape index: {}]  }
   0x1   :  { %12 = vsyncpa [#allocation3 + $0x1], 0 }
   0x2   :  { %13 = vsyncpa [#allocation6], 0 }
   0x3   :  { %14 = vsyncpa [#allocation4], 0 }
   0x4   :  { %16 = vsyncpa [#allocation4 + $0x1], 0  ;;  %s987_s18 = smov 0   ;;  %s989_s19 = smov 0  }
   0x5   :  { %s991_s20 = smov 0   ;;  %s993_s21 = smov 0  }
   0x6 LB: > { %s1008_s22 = sadd.s32 4294967295, %s946_s21   ;;  %s656_s23 = sadd.s32 4294967294, %s946_s21   ;;  %s946_s21 = sphi %s993_s21, %s1292_s21   ;;  %s942_s20 = sphi %s991_s20, %s1291_s20   ;;  %s938_s19 = sphi %s989_s19, %s1290_s19   ;;  %s934_s18 = sphi %s987_s18, %s1289_s18  }
   0x7   : > { %p42_p0 = scmp.ne.s32.totalorder %s938_s19, %s934_s18  ;;  %p1271_p1 = scmp.eq.s32.totalorder %s1008_s22, 0 }
   0x8   : > { %p156_p3 = scmp.eq.s32.totalorder %s656_s23, 1  ;;  %p657_p5 = scmp.ge.s32.totalorder %s946_s21, 1 }
   0x9   : > { %p1017_p4 = por %p1271_p1, %p42_p0  ;;  %p163_p7 = scmp.lt.s32.totalorder %s946_s21, 3 }
   0xa   : > { %p1022_p6 = por %p156_p3, %p42_p0  ;;  %s948_s27 = smov [#allocation5]  }
   0xb   : > { %s1275_s24 = scalar_select %p1017_p4, 1, 0 }
   0xc   : > { %s1276_s25 = scalar_select %p1022_p6, 1, 0 }
   0xd   : > { %p1027_p8 = pnand %p657_p5, %p163_p7  ;;  %s181_s28 = sshll.u32 %s948_s27, 4  ;;  %s182_s28 = int_to_ptr.vmem [resolvable:$true] %s181_s28 }
   0xe   : > { %s1041_s30 = sadd.s32 1, %s946_s21   ;;  %s29_s6 = sadd.s32 1, %s942_s20 }
   0xf   : > { %s1277_s26 = scalar_select %p1027_p8, 1, 0 }
  0x10   : > { %p745_p9 = pneg %p1027_p8  ;;  %s26_s7 = ssub.s32 %s946_s21, %s1041_s30 }
  0x11   : > { %s835_s8 = scalar_lea.vmem %s182_s28, 1024  ;;  %p843_p5 = scmp.lt.s32.totalorder %s182_s28, %s182_s28 }
  0x12   : > { %p1036_p11 = pnand %p745_p9, %p1271_p1  ;;  %p836_p13 = scmp.ne.s32.totalorder %s182_s28, %s835_s8 }
  0x13   : > { %p844_p7 = scmp.lt.s32.totalorder %s835_s8, %s835_s8 }
  0x14   : > { %p826_p12 = pneg %p1036_p11 }
  0x15   : > { %p845_p10 = por %p844_p7, %p843_p5 }
  0x16   : > { %p838_p0 = pnand %p836_p13, %p826_p12 }
  0x18   : > { %p839_p3 = pneg %p838_p0 }
  0x1a   : > { %p846_p2 = pnand %p845_p10, %p839_p3 }
  0x1c   : > { %849 = shalt.err (!%p846_p2)
}
  0x1d   : > { %s949_s9 = smov 64   ;;  %s950_s10 = smov 4  }
  0x1e   : > { %748 = dma.hbm_to_vmem [thread:$0]  (!%p1036_p11), %s1268_s3, 1024, %s182_s28, [#allocation6], %s949_s9, %s949_s9, %s950_s10  }
  0x1f   : > { %p27_p9 = scmp.eq.s32.totalorder %s26_s7, 0  ;;  %p36_p12 = scmp.ne.s32.totalorder %s942_s20, %s938_s19 }
  0x20   : > { %p37_p10 = scmp.eq.s32.totalorder %s946_s21, 0  ;;  %p758_p2 = scmp.lt.s32.totalorder %s946_s21, 2 }
  0x21   : > { %s1058_s13 = scalar_select %p27_p9, %s942_s20, %s29_s6  }
  0x22   : > { %p38_p13 = por %p37_p10, %p36_p12  ;;  %p1279_p0 = scmp.eq.s32.totalorder %s1008_s22, 1 }
  0x23   : > { %s198_s15 = sand.u32 1, %s942_s20   ;;  %s683_s16 = sshll.u32 %s946_s21, 10 }
  0x24   : > { %p1062_p3 = por %p1279_p0, %p36_p12  ;;  %s660_s17 = sshll.u32 %s198_s15, 6 }
  0x25   : > { %s1071_s29 = scalar_lea.hbm %s1265_s0, %s683_s16  ;;  %s202_s28 = scalar_lea.vmem [#allocation2], %s660_s17 }
  0x26   : > { %s1280_s14 = scalar_select %p1062_p3, 1, 0 }
  0x27   : > { %s209_s6 = sshll.u32 %s202_s28, 4  ;;  %p1073_p11 = pnand %p758_p2, %p38_p13  ;;  %s1077_s6 = int_to_ptr.vmem [resolvable:$true] %s209_s6 }
  0x28   : > { %s1079_s8 = scalar_lea.sflag [#allocation3], %s198_s15  ;;  %s850_s9 = scalar_lea.hbm %s1071_s29, 1024 }
  0x29   : > { %p851_p5 = scmp.ne.s32.totalorder %s1071_s29, %s850_s9  ;;  %p852_p7 = pneg %p1073_p11 }
  0x2a   : > { %s855_s12 = scalar_lea.hbm %s1265_s0, 2048  ;;  %p856_p10 = scmp.lt.s32.totalorder %s1071_s29, %s1265_s0 }
  0x2b   : > { %p853_p9 = pnand %p852_p7, %p851_p5  ;;  %p857_p2 = scmp.lt.s32.totalorder %s855_s12, %s850_s9 }
  0x2d   : > { %p854_p12 = pneg %p853_p9  ;;  %p858_p13 = por %p857_p2, %p856_p10 }
  0x2f   : > { %p859_p0 = pnand %p858_p13, %p854_p12 }
  0x31   : > { %862 = shalt.err (!%p859_p0)
}
  0x32   : > { %s863_s15 = scalar_lea.vmem %s1077_s6, 1024  ;;  %s951_s23 = smov [#allocation2]  }
  0x33   : > { %p864_p1 = scmp.ne.s32.totalorder %s1077_s6, %s863_s15  ;;  %s868_s27 = sshll.u32 %s951_s23, 4  ;;  %s869_s27 = int_to_ptr.vmem [resolvable:$false] %s868_s27 }
  0x34   : > { %s870_s28 = scalar_lea.vmem %s869_s27, 2048  ;;  %p871_p9 = scmp.lt.s32.totalorder %s1077_s6, %s869_s27 }
  0x35   : > { %p866_p6 = pnand %p864_p1, %p852_p7  ;;  %p872_p3 = scmp.lt.s32.totalorder %s870_s28, %s863_s15 }
  0x37   : > { %p867_p5 = pneg %p866_p6  ;;  %p873_p4 = por %p872_p3, %p871_p9 }
  0x39   : > { %p874_p8 = pnand %p873_p4, %p867_p5 }
  0x3b   : > { %877 = shalt.err (!%p874_p8)
}
  0x3c   : > { %s952_s9 = smov 128   ;;  %s953_s10 = smov 8  }
  0x3d   : > { %752 = dma.hbm_to_vmem [thread:$0]  (!%p1073_p11), %s1071_s29, 1024, %s1077_s6, %s1079_s8, %s952_s9, %s952_s9, %s953_s10  }
  0x3e   : > { %p1282_p1 = scmp.ne.s32.totalorder %s1277_s26, 0 }
  0x3f   : > { %s1103_s11 = sand.u32 (!%p1282_p1), 1, %s938_s19   ;;  %p1283_p4 = scmp.ne.s32.totalorder (!%p1282_p1), %s1275_s24, 0 }
  0x40   : > { %221 = sbr.rel (%p1282_p1) target bundleno = 486 (0x1e6), region = 40  ;;  %s664_s12 = sshll.u32 (!%p1282_p1), %s1103_s11, 6 }
  0x41   : > { %s224_s16 = scalar_lea.sflag (!%p1282_p1), [#allocation3], %s1103_s11  ;;  %s227_s17 = scalar_lea.vmem (!%p1282_p1), [#allocation2], %s664_s12 }
  0x45   : > { %921 = dma.done.wait (%p1283_p4), %s224_s16, 1024  }
  0x46   : > { %923 = vsyncadd (%p1283_p4), %s224_s16, 4294966272  ;;  %p1284_p6 = scmp.eq.s32.totalorder %s1008_s22, 0 }
  0x48   : > { %925 = dma.done.wait (%p1284_p6), [#allocation6], 1024   ;;  %p1285_p8 = pmov %p1284_p6 }
  0x49   : > { %v1117_v0 = vld [vmem:[%s227_s17 + $0x20] sm:$0xff]  ;;  %v1123_v2 = vld [vmem:[%s227_s17 + $0x28] sm:$0xff]  ;;  %v1127_v4 = vld [vmem:[%s227_s17 + $0x18] sm:$0xff]  ;;  %s257_s15 = scalar_lea.vmem [#allocation7], %s664_s12  ;;  %s684_s27 = sshll.u32 %s1008_s22, 10 }
  0x4a   : > { %927 = vsyncadd (%p1285_p8), [#allocation6], 4294966272  ;;  %v1119_v1 = vld [vmem:[%s227_s17] sm:$0xff]  ;;  %277 = vadd.xlane.f32.xlu1 %v1117_v0  ;;  %v1125_v3 = vld [vmem:[%s227_s17 + $0x8] sm:$0xff]  ;;  %v290_v10 = vmul.f32 %v1123_v2, %v1123_v2  ;;  %v289_v11 = vmul.f32 %v1117_v0, %v1117_v0  ;;  %v288_v12 = vmul.f32 %v1127_v4, %v1127_v4  ;;  %s573_s23 = sshll.u32 %s257_s15, 4  ;;  %s1222_s10 = scalar_lea.hbm %s1270_s5, %s684_s27  ;;  %s1217_s23 = int_to_ptr.vmem [resolvable:$true] %s573_s23 }
  0x4b   : > { %269 = vadd.xlane.f32.xlu0 %v1119_v1  ;;  %v1129_v5 = vld [vmem:[%s227_s17 + $0x10] sm:$0xff]  ;;  %v1135_v6 = vld [vmem:[%s227_s17 + $0x38] sm:$0xff]  ;;  %v286_v8 = vmul.f32 %v1125_v3, %v1125_v3  ;;  %v285_v9 = vmul.f32 %v1119_v1, %v1119_v1  ;;  %v802_v18 = vld [vmem:[#allocation5 + $0x28] sm:$0xff]   ;;  %s560_s12 = scalar_lea.sflag [#allocation4], %s1103_s11  ;;  %s878_s22 = scalar_lea.vmem %s1217_s23, 1024 }
  0x4c   : > { %v1137_v7 = vld [vmem:[%s227_s17 + $0x30] sm:$0xff]  ;;  %v287_v13 = vmul.f32 %v1129_v5, %v1129_v5  ;;  %v292_v14 = vmul.f32 %v1135_v6, %v1135_v6  ;;  %v800_v16 = vld [vmem:[#allocation5 + $0x38] sm:$0xff]   ;;  %v803_v19 = vld [vmem:[#allocation5 + $0x20] sm:$0xff]   ;;  %p879_p3 = scmp.ne.s32.totalorder %s1217_s23, %s878_s22  ;;  %p1286_p11 = scmp.ne.s32.totalorder %s1280_s14, 0 }
  0x4d   : > { %v291_v15 = vmul.f32 %v1137_v7, %v1137_v7  ;;  %697 = vmatprep.subr.bf16.mxu0 %v800_v16  ;;  %721 = vmatprep.subr.bf16.mxu1 %v800_v16  ;;  %v801_v17 = vld [vmem:[#allocation5 + $0x30] sm:$0xff]   ;;  %v804_v20 = vld [vmem:[#allocation5 + $0x18] sm:$0xff]   ;;  %v806_v22 = vld [vmem:[#allocation5 + $0x8] sm:$0xff]   ;;  %s954_s16 = smov [#allocation7]  }
  0x4e   : > { %279 = vadd.xlane.f32.xlu1 %v1123_v2  ;;  %698 = vmatpush3.bf16.msra.mxu0 %v800_v16  ;;  %v805_v21 = vld [vmem:[#allocation5 + $0x10] sm:$0xff]   ;;  %v807_v23 = vld [vmem:[#allocation5] sm:$0xff]   ;;  %p880_p7 = pnand %p879_p3, %p1286_p11  ;;  %s882_s17 = sshll.u32 %s954_s16, 4  ;;  %s883_s17 = int_to_ptr.vmem [resolvable:$false] %s882_s17 }
  0x4f   : > { %271 = vadd.xlane.f32.xlu0 %v1125_v3  ;;  %729 = vmatpush3.bf16.msra.mxu1 %v800_v16  ;;  %s884_s24 = scalar_lea.vmem %s883_s17, 2048  ;;  %p885_p10 = scmp.lt.s32.totalorder %s1217_s23, %s883_s17 }
  0x50   : > { %699 = vmatprep.subr.bf16.mxu0 %v801_v17  ;;  %722 = vmatprep.subr.bf16.mxu1 %v801_v17  ;;  %p881_p12 = pneg %p880_p7  ;;  %p886_p2 = scmp.lt.s32.totalorder %s884_s24, %s878_s22 }
  0x52   : > { %275 = vadd.xlane.f32.xlu1 %v1127_v4  ;;  %700 = vmatpush3.bf16.msra.mxu0 %v801_v17  ;;  %p887_p13 = por %p886_p2, %p885_p10 }
  0x53   : > { %273 = vadd.xlane.f32.xlu0 %v1129_v5  ;;  %730 = vmatpush3.bf16.msra.mxu1 %v801_v17 }
  0x54   : > { %701 = vmatprep.subr.bf16.mxu0 %v802_v18  ;;  %723 = vmatprep.subr.bf16.mxu1 %v802_v18  ;;  %p888_p0 = pnand %p887_p13, %p881_p12 }
  0x56   : > { %283 = vadd.xlane.f32.xlu1 %v1135_v6  ;;  %702 = vmatpush3.bf16.msra.mxu0 %v802_v18 }
  0x57   : > { %281 = vadd.xlane.f32.xlu0 %v1137_v7  ;;  %731 = vmatpush3.bf16.msra.mxu1 %v802_v18 }
  0x58   : > { %703 = vmatprep.subr.bf16.mxu0 %v803_v19  ;;  %724 = vmatprep.subr.bf16.mxu1 %v803_v19 }
  0x5a   : > { %295 = vadd.xlane.f32.xlu1 %v286_v8  ;;  %704 = vmatpush3.bf16.msra.mxu0 %v803_v19 }
  0x5b   : > { %293 = vadd.xlane.f32.xlu0 %v285_v9  ;;  %732 = vmatpush3.bf16.msra.mxu1 %v803_v19 }
  0x5c   : > { %705 = vmatprep.subr.bf16.mxu0 %v804_v20  ;;  %725 = vmatprep.subr.bf16.mxu1 %v804_v20 }
  0x5e   : > { %303 = vadd.xlane.f32.xlu1 %v290_v10  ;;  %706 = vmatpush3.bf16.msra.mxu0 %v804_v20 }
  0x5f   : > { %301 = vadd.xlane.f32.xlu0 %v289_v11  ;;  %733 = vmatpush3.bf16.msra.mxu1 %v804_v20 }
  0x60   : > { %707 = vmatprep.subr.bf16.mxu0 %v805_v21  ;;  %726 = vmatprep.subr.bf16.mxu1 %v805_v21 }
  0x62   : > { %299 = vadd.xlane.f32.xlu1 %v288_v12  ;;  %708 = vmatpush3.bf16.msra.mxu0 %v805_v21 }
  0x63   : > { %297 = vadd.xlane.f32.xlu0 %v287_v13  ;;  %734 = vmatpush3.bf16.msra.mxu1 %v805_v21 }
  0x64   : > { %709 = vmatprep.subr.bf16.mxu0 %v806_v22  ;;  %727 = vmatprep.subr.bf16.mxu1 %v806_v22 }
  0x66   : > { %307 = vadd.xlane.f32.xlu1 %v292_v14  ;;  %710 = vmatpush3.bf16.msra.mxu0 %v806_v22 }
  0x67   : > { %305 = vadd.xlane.f32.xlu0 %v291_v15  ;;  %735 = vmatpush3.bf16.msra.mxu1 %v806_v22 }
  0x68   : > { %711 = vmatprep.subr.bf16.mxu0 %v807_v23  ;;  %728 = vmatprep.subr.bf16.mxu1 %v807_v23 }
  0x6a   : > { %712 = vmatpush3.bf16.msra.mxu0 %v807_v23 }
  0x6b   : > { %736 = vmatpush3.bf16.msra.mxu1 %v807_v23 }
  0xd3   : > { %v278_v24 = vpop.xlane.xlu1 %277 }
  0xd4   : > { %v270_v25 = vpop.xlane.xlu0 %269  ;;  %v1161_v34 = vmul.f32 0.0078125, %v278_v24 }
  0xd5   : > { %v1157_v32 = vmul.f32 0.0078125, %v270_v25 }
  0xd6   : > { %v329_v44 = vmul.f32 %v1161_v34, %v1161_v34 }
  0xd7   : > { %v280_v26 = vpop.xlane.xlu1 %279  ;;  %v325_v38 = vmul.f32 %v1157_v32, %v1157_v32 }
  0xd8   : > { %v272_v27 = vpop.xlane.xlu0 %271  ;;  %v1163_v35 = vmul.f32 0.0078125, %v280_v26 }
  0xd9   : > { %v1159_v33 = vmul.f32 0.0078125, %v272_v27 }
  0xda   : > { %v330_v45 = vmul.f32 %v1163_v35, %v1163_v35 }
  0xdb   : > { %v276_v28 = vpop.xlane.xlu1 %275  ;;  %v326_v39 = vmul.f32 %v1159_v33, %v1159_v33 }
  0xdc   : > { %v274_v29 = vpop.xlane.xlu0 %273  ;;  %v1173_v46 = vmul.f32 0.0078125, %v276_v28 }
  0xdd   : > { %v1175_v53 = vmul.f32 0.0078125, %v274_v29 }
  0xde   : > { %v328_v58 = vmul.f32 %v1173_v46, %v1173_v46 }
  0xdf   : > { %v284_v30 = vpop.xlane.xlu1 %283  ;;  %v327_v10 = vmul.f32 %v1175_v53, %v1175_v53 }
  0xe0   : > { %v282_v31 = vpop.xlane.xlu0 %281  ;;  %v1179_v59 = vmul.f32 0.0078125, %v284_v30 }
  0xe1   : > { %v1181_v60 = vmul.f32 0.0078125, %v282_v31 }
  0xe2   : > { %v332_v15 = vmul.f32 %v1179_v59, %v1179_v59 }
  0xe3   : > { %v296_v36 = vpop.xlane.xlu1 %295  ;;  %v331_v16 = vmul.f32 %v1181_v60, %v1181_v60 }
  0xe4   : > { %v294_v37 = vpop.xlane.xlu0 %293  ;;  %v318_v40 = vmul.f32 0.0078125, %v296_v36  ;;  %v366_v36 = vsub.f32 %v1125_v3, %v1159_v33  ;;  %v370_v3 = vsub.f32 %v1123_v2, %v1163_v35 }
  0xe5   : > { %v317_v41 = vmul.f32 0.0078125, %v294_v37 }
  0xe6   : > { %v334_v42 = vsub.f32 %v318_v40, %v326_v39  ;;  %v667_v39 = vld [vmem:[%s1266_s1] ss:$0 sm:$0xff] }
  0xe7   : > { %v333_v43 = vsub.f32 %v317_v41, %v325_v38  ;;  %v304_v47 = vpop.xlane.xlu1 %303  ;;  %v365_v38 = vsub.f32 %v1119_v1, %v1157_v32  ;;  %v369_v1 = vsub.f32 %v1117_v0, %v1161_v34 }
  0xe8   : > { %v302_v48 = vpop.xlane.xlu0 %301  ;;  %v342_v49 = vmax.f32 %v334_v42, 0.0  ;;  %v322_v51 = vmul.f32 0.0078125, %v304_v47 }
  0xe9   : > { %v341_v50 = vmax.f32 %v333_v43, 0.0  ;;  %v321_v52 = vmul.f32 0.0078125, %v302_v48  ;;  %v668_v43 = vld [vmem:[%s1267_s2] ss:$0 sm:$0xff] }
  0xea   : > { %v350_v54 = vadd.f32 1e-05, %v342_v49  ;;  %v338_v56 = vsub.f32 %v322_v51, %v330_v45  ;;  %v368_v51 = vsub.f32 %v1127_v4, %v1173_v46  ;;  %v371_v4 = vsub.f32 %v1137_v7, %v1181_v60  ;;  %v669_v7 = vld [vmem:[%s1269_s4] ss:$0 sm:$0xff] }
  0xeb   : > { %v349_v55 = vadd.f32 1e-05, %v341_v50  ;;  %v337_v57 = vsub.f32 %v321_v52, %v329_v44  ;;  %v300_v61 = vpop.xlane.xlu1 %299 }
  0xec   : > { %v298_v62 = vpop.xlane.xlu0 %297  ;;  %808 = vrsqrt.f32 %v350_v54  ;;  %v346_v63 = vmax.f32 %v338_v56, 0.0  ;;  %v320_v9 = vmul.f32 0.0078125, %v300_v61  ;;  %v372_v61 = vsub.f32 %v1135_v6, %v1179_v59 }
  0xed   : > { %v345_v8 = vmax.f32 %v337_v57, 0.0  ;;  %810 = vrsqrt.f32 %v349_v55  ;;  %v319_v11 = vmul.f32 0.0078125, %v298_v62  ;;  %v367_v55 = vsub.f32 %v1129_v5, %v1175_v53 }
  0xee   : > { %v354_v12 = vadd.f32 1e-05, %v346_v63  ;;  %v336_v14 = vsub.f32 %v320_v9, %v328_v58 }
  0xef   : > { %v353_v13 = vadd.f32 1e-05, %v345_v8  ;;  %v335_v17 = vsub.f32 %v319_v11, %v327_v10  ;;  %v308_v18 = vpop.xlane.xlu1 %307 }
  0xf0   : > { %v306_v19 = vpop.xlane.xlu0 %305  ;;  %812 = vrsqrt.f32 %v354_v12  ;;  %v344_v20 = vmax.f32 %v336_v14, 0.0  ;;  %v324_v21 = vmul.f32 0.0078125, %v308_v18 }
  0xf1   : > { %v323_v22 = vmul.f32 0.0078125, %v306_v19  ;;  %814 = vrsqrt.f32 %v353_v13  ;;  %v343_v23 = vmax.f32 %v335_v17, 0.0 }
  0xf2   : > { %v352_v24 = vadd.f32 1e-05, %v344_v20  ;;  %v340_v25 = vsub.f32 %v324_v21, %v332_v15 }
  0xf3   : > { %v339_v26 = vsub.f32 %v323_v22, %v331_v16  ;;  %v351_v27 = vadd.f32 1e-05, %v343_v23 }
  0xf4   : > { %816 = vrsqrt.f32 %v352_v24  ;;  %v348_v28 = vmax.f32 %v340_v25, 0.0 }
  0xf5   : > { %v347_v29 = vmax.f32 %v339_v26, 0.0  ;;  %818 = vrsqrt.f32 %v351_v27 }
  0xf6   : > { %v356_v30 = vadd.f32 1e-05, %v348_v28 }
  0xf7   : > { %v355_v31 = vadd.f32 1e-05, %v347_v29 }
  0xf8   : > { %820 = vrsqrt.f32 %v356_v30 }
  0xf9   : > { %v809_v37 = vpop.eup %808  ;;  %822 = vrsqrt.f32 %v355_v31 }
  0xfa   : > { %v811_v40 = vpop.eup %810  ;;  %v374_v41 = vmul.f32 %v809_v37, %v366_v36 }
  0xfb   : > { %v373_v42 = vmul.f32 %v811_v40, %v365_v38 }
  0xfc   : > { %v389_v33 = vmul.f32 %v667_v39, %v374_v41 }
  0xfd   : > { %v813_v44 = vpop.eup %812  ;;  %v388_v32 = vmul.f32 %v667_v39, %v373_v42 }
  0xfe   : > { %v815_v45 = vpop.eup %814  ;;  %v404_v47 = vadd.f32 %v668_v43, %v389_v33  ;;  %v378_v48 = vmul.f32 %v813_v44, %v370_v3 }
  0xff   : > { %v403_v49 = vadd.f32 %v668_v43, %v388_v32  ;;  %v377_v50 = vmul.f32 %v815_v45, %v369_v1 }
 0x100   : > { %v393_v52 = vmul.f32 %v667_v39, %v378_v48 }
 0x101   : > { %v817_v54 = vpop.eup %816  ;;  %v411_v2 = vpack.c.bf16 %v404_v47, %v403_v49  ;;  %v392_v35 = vmul.f32 %v667_v39, %v377_v50 }
 0x102   : > { %v819_v56 = vpop.eup %818  ;;  %v408_v57 = vadd.f32 %v668_v43, %v393_v52  ;;  %v376_v58 = vmul.f32 %v817_v54, %v368_v51 }
 0x103   : > { %713 = vmatprep.mubr.bf16.mxu0 %v411_v2  ;;  %v407_v0 = vadd.f32 %v668_v43, %v392_v35  ;;  %v375_v34 = vmul.f32 %v819_v56, %v367_v55 }
 0x104   : > { %v391_v62 = vmul.f32 %v667_v39, %v376_v58 }
 0x105   : > { %v821_v63 = vpop.eup %820  ;;  %v413_v46 = vpack.c.bf16 %v408_v57, %v407_v0  ;;  %v390_v8 = vmul.f32 %v667_v39, %v375_v34 }
 0x106   : > { %v823_v9 = vpop.eup %822  ;;  %v406_v5 = vadd.f32 %v668_v43, %v391_v62  ;;  %v380_v53 = vmul.f32 %v821_v63, %v372_v61 }
 0x107   : > { %717 = vmatprep.mubr.bf16.mxu1 %v413_v46  ;;  %v405_v10 = vadd.f32 %v668_v43, %v390_v8  ;;  %v379_v11 = vmul.f32 %v823_v9, %v371_v4 }
 0x108   : > { %v395_v12 = vmul.f32 %v667_v39, %v380_v53 }
 0x109   : > { %v412_v13 = vpack.c.bf16 %v406_v5, %v405_v10  ;;  %v394_v14 = vmul.f32 %v667_v39, %v379_v11 }
 0x10a   : > { %v410_v15 = vadd.f32 %v668_v43, %v395_v12 }
 0x10b   : > { %714 = vmatmul.mubr.bf16.vlgmr.msra.gmra.mxu0 %v412_v13  ;;  %v409_v6 = vadd.f32 %v668_v43, %v394_v14 }
 0x10d   : > { %v414_v59 = vpack.c.bf16 %v410_v15, %v409_v6 }
 0x10f   : > { %718 = vmatmul.mubr.bf16.vlgmr.msra.gmra.mxu1 %v414_v59 }
 0x1cb   : > { %v715_v60 = vpop.f32.mrf.mxu0 }
 0x1cc   : > { %v529_v16 = vadd.f32 %v715_v60, %v669_v7 }
 0x1cd   : > { %v520_v17 = vpop.f32.mrf.mxu0 }
 0x1ce   : > { %553 = vst [vmem:[%s257_s15 + $0x10] sm:$0xff] %v529_v16  ;;  %v521_v18 = vadd.f32 %v669_v7, %v520_v17 }
 0x1cf   : > { %v716_v19 = vpop.f32.mrf.mxu0  ;;  %v719_v20 = vpop.f32.mrf.mxu1 }
 0x1d0   : > { %551 = vst [vmem:[%s257_s15] sm:$0xff] %v521_v18  ;;  %v532_v21 = vadd.f32 %v716_v19, %v669_v7  ;;  %v545_v22 = vadd.f32 %v719_v20, %v669_v7 }
 0x1d1   : > { %v523_v23 = vpop.f32.mrf.mxu0  ;;  %v536_v24 = vpop.f32.mrf.mxu1 }
 0x1d2   : > { %554 = vst [vmem:[%s257_s15 + $0x18] sm:$0xff] %v532_v21  ;;  %557 = vst [vmem:[%s257_s15 + $0x30] sm:$0xff] %v545_v22  ;;  %v524_v25 = vadd.f32 %v669_v7, %v523_v23  ;;  %v537_v26 = vadd.f32 %v669_v7, %v536_v24 }
 0x1d3   : > { %v720_v27 = vpop.f32.mrf.mxu1 }
 0x1d4   : > { %552 = vst [vmem:[%s257_s15 + $0x8] sm:$0xff] %v524_v25  ;;  %555 = vst [vmem:[%s257_s15 + $0x20] sm:$0xff] %v537_v26  ;;  %v548_v28 = vadd.f32 %v720_v27, %v669_v7 }
 0x1d5   : > { %v539_v29 = vpop.f32.mrf.mxu1 }
 0x1d6   : > { %558 = vst [vmem:[%s257_s15 + $0x38] sm:$0xff] %v548_v28  ;;  %v540_v30 = vadd.f32 %v669_v7, %v539_v29 }
 0x1d8   : > { %556 = vst [vmem:[%s257_s15 + $0x28] sm:$0xff] %v540_v30 }
 0x1d9   : > { %891 = shalt.err (!%p888_p0)
}
 0x1da   : > { %s892_s26 = scalar_lea.hbm %s1222_s10, 1024  ;;  %s896_s7 = scalar_lea.hbm %s1270_s5, 2048 }
 0x1db   : > { %p893_p5 = scmp.ne.s32.totalorder %s1222_s10, %s892_s26  ;;  %p897_p4 = scmp.lt.s32.totalorder %s1222_s10, %s1270_s5 }
 0x1dc   : > { %p898_p6 = scmp.lt.s32.totalorder %s896_s7, %s892_s26 }
 0x1dd   : > { %p894_p9 = pnand %p893_p5, %p1286_p11 }
 0x1de   : > { %p899_p8 = por %p898_p6, %p897_p4 }
 0x1df   : > { %p895_p1 = pneg %p894_p9 }
 0x1e1   : > { %p900_p3 = pnand %p899_p8, %p895_p1 }
 0x1e3   : > { %903 = shalt.err (!%p900_p3)
}
 0x1e4   : > { %s955_s27 = smov 128   ;;  %s956_s28 = smov 8  }
 0x1e5   : > { %743 = dma.vmem_to_hbm [thread:$0]  (%p1286_p11), %s1217_s23, 1024, %s1222_s10, %s560_s12, %s955_s27, %s955_s27, %s956_s28  }
 0x1e6 PF: > { %s588_s9 = sand.u32 1, %s934_s18   ;;  %p1287_p7 = scmp.ne.s32.totalorder %s1276_s25, 0 }
 0x1e7   : > { %p1288_p12 = scmp.ge.s32.totalorder %s946_s21, 2  ;;  %s589_s22 = scalar_lea.sflag [#allocation4], %s588_s9 }
 0x1e9   : > { %p754_p10 = pnand %p1288_p12, %p1287_p7 }
 0x1eb   : > { %p755_p2 = pneg %p754_p10 }
 0x1ed   : > { %929 = dma.done.wait (%p755_p2), %s589_s22, 1024  }
 0x1ee   : > { %931 = vsyncadd (%p755_p2), %s589_s22, 4294966272  ;;  %p19_p13 = scmp.ge.s32.totalorder %s1041_s30, 4   ;;  %s1289_s18 = smov %s938_s19 }
 0x1ef   : > { %s1290_s19 = smov %s942_s20  ;;  %s1291_s20 = smov %s1058_s13 }
 0x1f0   : > { %s1292_s21 = smov %s1041_s30  ;;  %21 = sbr.rel (!%p19_p13) target bundleno = 6 (0x6), region = 89 }
 0x1f5   :  { %594 = vsyncpa [#allocation3], 1 }
 0x1f6   :  { %596 = vsyncpa [#allocation3 + $0x1], 1 }
 0x1f7   :  { %597 = vsyncpa [#allocation6], 1 }
 0x1f8   :  { %598 = vsyncpa [#allocation4], 1 }
 0x1f9   :  { %600 = vsyncpa [#allocation4 + $0x1], 1 }

</bundles_post_ra>
